<compile_context>
chip_gen: v7x
topology: tpu7x:2x2x1
jax: 0.10.0
libtpu: 0.0.40
codegen_flags: <defaults>
</compile_context>

<pallas_src>
import jax
import jax.numpy as jnp
from jax.experimental import pallas as pl
from jax.experimental.pallas import tpu as pltpu

LANE = 128  # TPU lane width; the hidden (contraction) dim is padded to this.


def _round_up(x, m):
    return (x + m - 1) // m * m


def autoencoder_kernel(x_ref, w1_ref, b1_ref, w2_ref, b2_ref, o_ref):
    # Encoder: h = tanh(x @ W1 + b1). Cast the f32 x tile to bf16 right before
    # the MXU; accumulate and run the epilogue in f32.
    x = x_ref[...].astype(w1_ref.dtype)
    h = jnp.dot(x, w1_ref[...], preferred_element_type=jnp.float32)
    h = jnp.tanh(h + b1_ref[...])                      # b1 is (1, Hp) -> broadcasts
    # Decoder: y = tanh(h @ W2 + b2). W2 is (Hp, D) so y is already (TB, D).
    y = jnp.dot(h.astype(w2_ref.dtype), w2_ref[...],
                preferred_element_type=jnp.float32)
    o_ref[...] = jnp.tanh(y + b2_ref[...]).astype(o_ref.dtype)


def autoencoder_forward(x, w1, b1, w2, b2, *, block_b=2048,
                        compute_dtype=jnp.bfloat16):
    """y = tanh(tanh(x @ w1 + b1) @ w2 + b2), tiled over the batch dim."""
    B, D = x.shape
    H = w1.shape[1]
    Hp = _round_up(H, LANE)              # lane-dense hidden (contraction) dim

    # Batch tile: multiple of 8 (sublane), capped at ~half the batch so there
    # are >= 2 grid steps whenever possible (v7x has 2 TensorCores).
    B8 = _round_up(B, 8)
    TB = min(block_b, B8)
    if B8 >= 16:
        TB = min(TB, max(8, _round_up(-(-B // 2), 8)))
    Bp = _round_up(B, TB)

    # x: pad only the batch dim (if needed); keep f32 and the native 64 lanes.
    xp = x if Bp == B else jnp.pad(x, ((0, Bp - B), (0, 0)))
    # Weights: pad only the hidden dim; zero rows/cols contribute nothing.
    w1p = jnp.pad(w1, ((0, 0), (0, Hp - H))).astype(compute_dtype)
    w2p = jnp.pad(w2, ((0, Hp - H), (0, 0))).astype(compute_dtype)
    b1p = jnp.pad(b1.reshape(1, -1), ((0, 0), (0, Hp - H))).astype(jnp.float32)
    b2p = b2.reshape(1, -1).astype(jnp.float32)

    grid = (Bp // TB,)
    out = pl.pallas_call(
        autoencoder_kernel,
        out_shape=jax.ShapeDtypeStruct((Bp, D), jnp.float32),
        grid_spec=pltpu.PrefetchScalarGridSpec(
            num_scalar_prefetch=0,
            grid=grid,
            in_specs=[
                # x tile marches over the batch; weights/biases are constant
                # blocks (fetched once, VMEM-resident across grid steps).
                pl.BlockSpec((TB, D), lambda i: (i, 0)),
                pl.BlockSpec((D, Hp), lambda i: (0, 0)),
                pl.BlockSpec((1, Hp), lambda i: (0, 0)),
                pl.BlockSpec((Hp, D), lambda i: (0, 0)),
                pl.BlockSpec((1, D),  lambda i: (0, 0)),
            ],
            out_specs=pl.BlockSpec((TB, D), lambda i: (i, 0)),
        ),
        compiler_params=pltpu.CompilerParams(
            dimension_semantics=("parallel",)),   # independent batch tiles
    )(xp, w1p, b1p, w2p, b2p)
    return out if Bp == B else out[:B]


def init_params(key, input_dim, hidden_1, init_std=0.02):
    # Mirrors Autoencoder.init_weights(): encoder weight ~ N(0, 0.02), bias 0.
    # The PyTorch module leaves the decoder at its default init; here both are
    # drawn from the same normal for a deterministic, reproducible setup.
    k1, k2 = jax.random.split(key)
    # PyTorch Linear stores weight as (out, in); we build (in, out) directly.
    w1 = init_std * jax.random.normal(k1, (input_dim, hidden_1), jnp.float32)
    b1 = jnp.zeros((hidden_1,), jnp.float32)
    w2 = init_std * jax.random.normal(k2, (hidden_1, input_dim), jnp.float32)
    b2 = jnp.zeros((input_dim,), jnp.float32)
    return w1, b1, w2, b2


if __name__ == "__main__":
    key = jax.random.PRNGKey(0)
    k_x, k_p = jax.random.split(key)

    batch = 512          # exercises the batch grid (2 parallel tiles of 256)
    input_dim = 64
    hidden_1 = 32

    x = jax.random.normal(k_x, (batch, input_dim), jnp.float32)
    w1, b1, w2, b2 = init_params(k_p, input_dim, hidden_1)

    out = jax.block_until_ready(autoencoder_forward(x, w1, b1, w2, b2))

    # Reference in plain JAX, mirroring the kernel's bf16 MXU inputs with f32
    # accumulation / f32 tanh.
    q = lambda a: a.astype(jnp.bfloat16).astype(jnp.float32)
    h_ref = jnp.tanh(q(x) @ q(w1) + b1.reshape(1, -1))
    ref = jnp.tanh(q(h_ref) @ q(w2) + b2.reshape(1, -1))

    assert out.shape == (batch, input_dim)
    assert jnp.allclose(out, ref, atol=1e-2, rtol=1e-2)

    print("KERNEL_OK")
</pallas_src>

<mosaic_0001>
module attributes {stable_mosaic.version = 11 : i64} {
  func.func @autoencoder_kernel(%arg0: i32, %arg1: memref<256x64xf32, #tpu.memory_space<vmem>>, %arg2: memref<64x128xbf16, #tpu.memory_space<vmem>>, %arg3: memref<1x128xf32, #tpu.memory_space<vmem>>, %arg4: memref<128x64xbf16, #tpu.memory_space<vmem>>, %arg5: memref<1x64xf32, #tpu.memory_space<vmem>>, %arg6: memref<256x64xf32, #tpu.memory_space<vmem>>) attributes {dimension_semantics = [#tpu.dimension_semantics<parallel>], iteration_bounds = array<i64: 2>, scalar_prefetch = 0 : i64, scratch_operands = 0 : i64, tpu.core_type = #tpu.core_type<tc>, window_params = [{transform_indices = @transform_0, window_bounds = array<i64: 256, 64>}, {pipeline_mode = #tpu.pipeline_mode<synchronous>, transform_indices = @transform_1, window_bounds = array<i64: 64, 128>}, {pipeline_mode = #tpu.pipeline_mode<synchronous>, transform_indices = @transform_2, window_bounds = array<i64: 1, 128>}, {pipeline_mode = #tpu.pipeline_mode<synchronous>, transform_indices = @transform_3, window_bounds = array<i64: 128, 64>}, {pipeline_mode = #tpu.pipeline_mode<synchronous>, transform_indices = @transform_4, window_bounds = array<i64: 1, 64>}, {transform_indices = @transform_5, window_bounds = array<i64: 256, 64>}]} {
    %c0 = arith.constant 0 : index
    %c0_0 = arith.constant 0 : index
    %0 = vector.load %arg1[%c0, %c0_0] : memref<256x64xf32, #tpu.memory_space<vmem>>, vector<256x64xf32>
    %1 = arith.truncf %0 : vector<256x64xf32> to vector<256x64xbf16>
    %c0_1 = arith.constant 0 : index
    %c0_2 = arith.constant 0 : index
    %2 = vector.load %arg2[%c0_1, %c0_2] : memref<64x128xbf16, #tpu.memory_space<vmem>>, vector<64x128xbf16>
    %cst = arith.constant dense<0.000000e+00> : vector<256x128xf32>
    %3 = tpu.matmul %1, %2, %cst {dimension_numbers = #tpu.dot_dimension_numbers<[1], [0], [0], [1], [0, 0, 1, 1], [], []>} : vector<256x64xbf16>, vector<64x128xbf16>, vector<256x128xf32> -> vector<256x128xf32>
    %c0_3 = arith.constant 0 : index
    %c0_4 = arith.constant 0 : index
    %4 = vector.load %arg3[%c0_3, %c0_4] : memref<1x128xf32, #tpu.memory_space<vmem>>, vector<1x128xf32>
    %5 = vector.broadcast %4 : vector<1x128xf32> to vector<256x128xf32>
    %6 = arith.addf %3, %5 : vector<256x128xf32>
    %7 = math.tanh %6 : vector<256x128xf32>
    %8 = arith.truncf %7 : vector<256x128xf32> to vector<256x128xbf16>
    %c0_5 = arith.constant 0 : index
    %c0_6 = arith.constant 0 : index
    %9 = vector.load %arg4[%c0_5, %c0_6] : memref<128x64xbf16, #tpu.memory_space<vmem>>, vector<128x64xbf16>
    %cst_7 = arith.constant dense<0.000000e+00> : vector<256x64xf32>
    %10 = tpu.matmul %8, %9, %cst_7 {dimension_numbers = #tpu.dot_dimension_numbers<[1], [0], [0], [1], [0, 0, 1, 1], [], []>} : vector<256x128xbf16>, vector<128x64xbf16>, vector<256x64xf32> -> vector<256x64xf32>
    %c0_8 = arith.constant 0 : index
    %c0_9 = arith.constant 0 : index
    %11 = vector.load %arg5[%c0_8, %c0_9] : memref<1x64xf32, #tpu.memory_space<vmem>>, vector<1x64xf32>
    %12 = vector.broadcast %11 : vector<1x64xf32> to vector<256x64xf32>
    %13 = arith.addf %10, %12 : vector<256x64xf32>
    %14 = math.tanh %13 : vector<256x64xf32>
    %c0_10 = arith.constant 0 : index
    %c0_11 = arith.constant 0 : index
    %15 = vector.load %arg6[%c0_10, %c0_11] : memref<256x64xf32, #tpu.memory_space<vmem>>, vector<256x64xf32>
    tpu.vector_store %arg6[%c0_10, %c0_11], %14 {strides = array<i32>} : memref<256x64xf32, #tpu.memory_space<vmem>>, vector<256x64xf32>,
    return
  }
  func.func @transform_0(%arg0: i32) -> (i32, i32) {
    %c0_i32 = arith.constant 0 : i32
    %c0_i32_0 = arith.constant 0 : i32
    return %arg0, %c0_i32 : i32, i32
  }
  func.func @transform_1(%arg0: i32) -> (i32, i32) {
    %c0_i32 = arith.constant 0 : i32
    %c0_i32_0 = arith.constant 0 : i32
    %c0_i32_1 = arith.constant 0 : i32
    return %c0_i32, %c0_i32_0 : i32, i32
  }
  func.func @transform_2(%arg0: i32) -> (i32, i32) {
    %c0_i32 = arith.constant 0 : i32
    %c0_i32_0 = arith.constant 0 : i32
    %c0_i32_1 = arith.constant 0 : i32
    return %c0_i32, %c0_i32_0 : i32, i32
  }
  func.func @transform_3(%arg0: i32) -> (i32, i32) {
    %c0_i32 = arith.constant 0 : i32
    %c0_i32_0 = arith.constant 0 : i32
    %c0_i32_1 = arith.constant 0 : i32
    return %c0_i32, %c0_i32_0 : i32, i32
  }
  func.func @transform_4(%arg0: i32) -> (i32, i32) {
    %c0_i32 = arith.constant 0 : i32
    %c0_i32_0 = arith.constant 0 : i32
    %c0_i32_1 = arith.constant 0 : i32
    return %c0_i32, %c0_i32_0 : i32, i32
  }
  func.func @transform_5(%arg0: i32) -> (i32, i32) {
    %c0_i32 = arith.constant 0 : i32
    %c0_i32_0 = arith.constant 0 : i32
    return %arg0, %c0_i32 : i32, i32
  }
}

</mosaic_0001>

<bundles_post_ra>
// kernel: tpu_custom_call.1
= control target key start
LH: loop header
LB: loop body
LE: loop exit
PB: predicated region body
PF: predicated region fallthrough
CT: control target
= control target key end

     0   :  { %s1301_s18 = smov 0   ;;  %s1551_s0 = inlined_call_operand.vmem [shape: f32[512,64], index: 0, kind: input, shape index: {}]   ;;  %s1552_s1 = inlined_call_operand.vmem [shape: bf16[64,128], index: 1, kind: input, shape index: {}]   ;;  %s1553_s2 = inlined_call_operand.vmem [shape: f32[1,128], index: 2, kind: input, shape index: {}]   ;;  %s1554_s3 = inlined_call_operand.vmem [shape: bf16[128,64], index: 3, kind: input, shape index: {}]   ;;  %s1555_s4 = inlined_call_operand.vmem [shape: f32[1,64], index: 4, kind: input, shape index: {}]   ;;  %s1556_s5 = inlined_call_operand.vmem [shape: f32[512,64], index: 5, kind: output, shape index: {}]  }
   0x1 LB: > { %s926_s19 = sadd.s32 4294967295, %s1269_s18   ;;  %p930_p0 = scmp.ge.s32.totalorder %s1269_s18, 1  ;;  %s1269_s18 = sphi %s1301_s18, %s15_s18  }
   0x2   : > { %p188_p1 = scmp.lt.s32.totalorder %s1269_s18, 3 }
   0x4   : > { %p189_p2 = pnand %p930_p0, %p188_p1 }
   0x5   : > { %v1123_v0 = vld [vmem:[%s1552_s1] sm:$0xff] (!%p189_p2)   ;;  %s931_s22 = sshll.u32 (!%p189_p2), %s926_s19, 5  ;;  %v1124_v1 = vld [vmem:[%s1552_s1 + $0x8] sm:$0xff] (!%p189_p2)   ;;  %v1125_v2 = vld [vmem:[%s1552_s1 + $0x10] sm:$0xff] (!%p189_p2)   ;;  %vm316_vm0 = vcmask (!%p189_p2), 523264  }
   0x6   : > { %192 = sbr.rel (%p189_p2) target bundleno = 538 (0x21a), region = 40  ;;  %p217_p3 = scmp.lt.s32.totalorder (!%p189_p2), %s931_s22, 63  ;;  %1011 = vmatprep.subr.bf16.mxu0 (!%p189_p2), %v1123_v0  ;;  %v1127_v3 = vld [vmem:[%s1554_s3] sm:$0xff] (!%p189_p2)   ;;  %v1128_v4 = vld [vmem:[%s1554_s3 + $0x8] sm:$0xff] (!%p189_p2)   ;;  %v1126_v7 = vld [vmem:[%s1552_s1 + $0x18] sm:$0xff] (!%p189_p2)  }
   0x7   : > { %1012 = vmatpush3.bf16.msra.mxu0 (!%p189_p2), %v1123_v0  ;;  %1099 = vmatprep.subr.bf16.mxu1 (!%p189_p2), %v1127_v3  ;;  %v1129_v9 = vld [vmem:[%s1554_s3 + $0x10] sm:$0xff] (!%p189_p2)   ;;  %v1130_v55 = vld [vmem:[%s1554_s3 + $0x18] sm:$0xff] (!%p189_p2)   ;;  %v1131_v56 = vld [vmem:[%s1554_s3 + $0x20] sm:$0xff] (!%p189_p2)  }
   0x8   : > { %1013 = vmatprep.subr.bf16.mxu0 (!%p189_p2), %v1124_v1  ;;  %1107 = vmatpush3.bf16.msra.mxu1 (!%p189_p2), %v1127_v3  ;;  %v1132_v57 = vld [vmem:[%s1554_s3 + $0x28] sm:$0xff] (!%p189_p2)   ;;  %v1133_v58 = vld [vmem:[%s1554_s3 + $0x30] sm:$0xff] (!%p189_p2)   ;;  %v1134_v59 = vld [vmem:[%s1554_s3 + $0x38] sm:$0xff] (!%p189_p2)  }
   0x9   : > { %1100 = vmatprep.subr.bf16.mxu1 (!%p189_p2), %v1128_v4  ;;  %v1406_v60 = vld [vmem:[%s1553_s2] ss:$0 sm:$0xff] (!%p189_p2) }
   0xb   : > { %1014 = vmatpush3.bf16.msra.mxu0 (!%p189_p2), %v1124_v1 }
   0xc   : > { %1015 = vmatprep.subr.bf16.mxu0 (!%p189_p2), %v1125_v2  ;;  %1108 = vmatpush3.bf16.msra.mxu1 (!%p189_p2), %v1128_v4 }
   0xd   : > { %s1558_s22 = smov (!%p217_p3, %s931_s22), 63  ;;  %1101 = vmatprep.subr.bf16.mxu1 %v1129_v9 }
   0xe   : > { %s932_s29 = sshll.u32 %s1558_s22, 3 }
   0xf   : > { %s1329_s7 = scalar_lea.vmem %s1551_s0, %s932_s29  ;;  %1016 = vmatpush3.bf16.msra.mxu0 %v1125_v2  ;;  %s1456_s8 = scalar_lea.vmem %s1556_s5, %s932_s29 }
  0x10   : > { %v229_v5 = vld [vmem:[%s1329_s7] sm:$0xff]  ;;  %v230_v6 = vld [vmem:[%s1329_s7 + $0x8] sm:$0xff]  ;;  %v231_v10 = vld [vmem:[%s1329_s7 + $0x10] sm:$0xff]  ;;  %1017 = vmatprep.subr.bf16.mxu0 %v1126_v7  ;;  %1109 = vmatpush3.bf16.msra.mxu1 %v1129_v9 }
  0x11   : > { %v261_v8 = vpack.c.bf16 %v230_v6, %v229_v5  ;;  %v232_v11 = vld [vmem:[%s1329_s7 + $0x18] sm:$0xff]  ;;  %v233_v12 = vld [vmem:[%s1329_s7 + $0x20] sm:$0xff]  ;;  %v234_v13 = vld [vmem:[%s1329_s7 + $0x28] sm:$0xff]  ;;  %1102 = vmatprep.subr.bf16.mxu1 %v1130_v55 }
  0x12   : > { %v262_v14 = vpack.c.bf16 %v232_v11, %v231_v10  ;;  %v263_v15 = vpack.c.bf16 %v234_v13, %v233_v12  ;;  %v235_v16 = vld [vmem:[%s1329_s7 + $0x30] sm:$0xff]  ;;  %v236_v17 = vld [vmem:[%s1329_s7 + $0x38] sm:$0xff]  ;;  %v237_v18 = vld [vmem:[%s1329_s7 + $0x40] sm:$0xff] }
  0x13   : > { %1019 = vmatprep.mubr.msk.bf16.mxu0 %vm316_vm0, %v261_v8  ;;  %1018 = vmatpush3.bf16.msra.mxu0 %v1126_v7  ;;  %v238_v19 = vld [vmem:[%s1329_s7 + $0x48] sm:$0xff]  ;;  %v264_v20 = vpack.c.bf16 %v236_v17, %v235_v16  ;;  %v239_v22 = vld [vmem:[%s1329_s7 + $0x50] sm:$0xff]  ;;  %v240_v23 = vld [vmem:[%s1329_s7 + $0x58] sm:$0xff] }
  0x14   : > { %1051 = vmatprep.subr.bf16.mxu0 %v1127_v3  ;;  %v265_v21 = vpack.c.bf16 %v238_v19, %v237_v18  ;;  %v241_v24 = vld [vmem:[%s1329_s7 + $0x60] sm:$0xff]  ;;  %v242_v25 = vld [vmem:[%s1329_s7 + $0x68] sm:$0xff]  ;;  %v266_v26 = vpack.c.bf16 %v240_v23, %v239_v22  ;;  %v243_v28 = vld [vmem:[%s1329_s7 + $0x70] sm:$0xff]  ;;  %1110 = vmatpush3.bf16.msra.mxu1 %v1130_v55 }
  0x15   : > { %v267_v27 = vpack.c.bf16 %v242_v25, %v241_v24  ;;  %v244_v29 = vld [vmem:[%s1329_s7 + $0x78] sm:$0xff]  ;;  %v245_v30 = vld [vmem:[%s1329_s7 + $0x80] sm:$0xff]  ;;  %v246_v31 = vld [vmem:[%s1329_s7 + $0x88] sm:$0xff]  ;;  %1103 = vmatprep.subr.bf16.mxu1 %v1131_v56 }
  0x16   : > { %1020 = vmatmul.mubr.msk.bf16.vlgmr.msra.gmra.mrb[0].mxu0 %vm316_vm0, %v262_v14  ;;  %v268_v32 = vpack.c.bf16 %v244_v29, %v243_v28  ;;  %v269_v33 = vpack.c.bf16 %v246_v31, %v245_v30  ;;  %v247_v34 = vld [vmem:[%s1329_s7 + $0x90] sm:$0xff]  ;;  %v248_v35 = vld [vmem:[%s1329_s7 + $0x98] sm:$0xff]  ;;  %v249_v36 = vld [vmem:[%s1329_s7 + $0xa0] sm:$0xff] }
  0x17   : > { %1023 = vmatprep.mubr.msk.bf16.mxu0 %vm316_vm0, %v263_v15  ;;  %1052 = vmatpush3.bf16.msra.mxu0 %v1127_v3  ;;  %v250_v37 = vld [vmem:[%s1329_s7 + $0xa8] sm:$0xff]  ;;  %v270_v38 = vpack.c.bf16 %v248_v35, %v247_v34  ;;  %v251_v40 = vld [vmem:[%s1329_s7 + $0xb0] sm:$0xff]  ;;  %v252_v41 = vld [vmem:[%s1329_s7 + $0xb8] sm:$0xff] }
  0x18   : > { %1053 = vmatprep.subr.bf16.mxu0 %v1128_v4  ;;  %v271_v39 = vpack.c.bf16 %v250_v37, %v249_v36  ;;  %v253_v42 = vld [vmem:[%s1329_s7 + $0xc0] sm:$0xff]  ;;  %v254_v43 = vld [vmem:[%s1329_s7 + $0xc8] sm:$0xff]  ;;  %v272_v44 = vpack.c.bf16 %v252_v41, %v251_v40  ;;  %v255_v46 = vld [vmem:[%s1329_s7 + $0xd0] sm:$0xff]  ;;  %1111 = vmatpush3.bf16.msra.mxu1 %v1131_v56 }
  0x19   : > { %v273_v45 = vpack.c.bf16 %v254_v43, %v253_v42  ;;  %v256_v47 = vld [vmem:[%s1329_s7 + $0xd8] sm:$0xff]  ;;  %v257_v48 = vld [vmem:[%s1329_s7 + $0xe0] sm:$0xff]  ;;  %v258_v49 = vld [vmem:[%s1329_s7 + $0xe8] sm:$0xff]  ;;  %1104 = vmatprep.subr.bf16.mxu1 %v1132_v57 }
  0x1a   : > { %v274_v50 = vpack.c.bf16 %v256_v47, %v255_v46  ;;  %v275_v51 = vpack.c.bf16 %v258_v49, %v257_v48  ;;  %v259_v52 = vld [vmem:[%s1329_s7 + $0xf0] sm:$0xff]  ;;  %v260_v53 = vld [vmem:[%s1329_s7 + $0xf8] sm:$0xff] }
  0x1b   : > { %1054 = vmatpush3.bf16.msra.mxu0 %v1128_v4  ;;  %v276_v54 = vpack.c.bf16 %v260_v53, %v259_v52 }
  0x1c   : > { %1055 = vmatprep.subr.bf16.mxu0 %v1129_v9  ;;  %1112 = vmatpush3.bf16.msra.mxu1 %v1132_v57 }
  0x1d   : > { %1105 = vmatprep.subr.bf16.mxu1 %v1133_v58 }
  0x1e   : > { %1024 = vmatmul.mubr.msk.bf16.gmra.mrb[4].mxu0 %vm316_vm0, %v264_v20 }
  0x1f   : > { %1027 = vmatprep.mubr.msk.bf16.mxu0 %vm316_vm0, %v265_v21  ;;  %1056 = vmatpush3.bf16.msra.mxu0 %v1129_v9 }
  0x20   : > { %1057 = vmatprep.subr.bf16.mxu0 %v1130_v55  ;;  %1113 = vmatpush3.bf16.msra.mxu1 %v1133_v58 }
  0x21   : > { %1106 = vmatprep.subr.bf16.mxu1 %v1134_v59 }
  0x23   : > { %1058 = vmatpush3.bf16.msra.mxu0 %v1130_v55 }
  0x24   : > { %1059 = vmatprep.subr.bf16.mxu0 %v1131_v56  ;;  %1114 = vmatpush3.bf16.msra.mxu1 %v1134_v59 }
  0x26   : > { %1028 = vmatmul.mubr.msk.bf16.gmra.mrb[8].mxu0 %vm316_vm0, %v266_v26 }
  0x27   : > { %1031 = vmatprep.mubr.msk.bf16.mxu0 %vm316_vm0, %v267_v27  ;;  %1060 = vmatpush3.bf16.msra.mxu0 %v1131_v56 }
  0x28   : > { %1061 = vmatprep.subr.bf16.mxu0 %v1132_v57 }
  0x2b   : > { %1062 = vmatpush3.bf16.msra.mxu0 %v1132_v57 }
  0x2c   : > { %1063 = vmatprep.subr.bf16.mxu0 %v1133_v58 }
  0x2e   : > { %1032 = vmatmul.mubr.msk.bf16.gmra.mrb[12].mxu0 %vm316_vm0, %v268_v32 }
  0x2f   : > { %1035 = vmatprep.mubr.msk.bf16.mxu0 %vm316_vm0, %v269_v33  ;;  %1064 = vmatpush3.bf16.msra.mxu0 %v1133_v58 }
  0x30   : > { %1065 = vmatprep.subr.bf16.mxu0 %v1134_v59 }
  0x33   : > { %1066 = vmatpush3.bf16.msra.mxu0 %v1134_v59 }
  0x36   : > { %1036 = vmatmul.mubr.msk.bf16.gmra.mrb[16].mxu0 %vm316_vm0, %v270_v38 }
  0x37   : > { %1039 = vmatprep.mubr.msk.bf16.mxu0 %vm316_vm0, %v271_v39 }
  0x3e   : > { %1040 = vmatmul.mubr.msk.bf16.gmra.mrb[20].mxu0 %vm316_vm0, %v272_v44 }
  0x3f   : > { %1043 = vmatprep.mubr.msk.bf16.mxu0 %vm316_vm0, %v273_v45 }
  0x46   : > { %1044 = vmatmul.mubr.msk.bf16.gmra.mrb[24].mxu0 %vm316_vm0, %v274_v50 }
  0x47   : > { %1047 = vmatprep.mubr.msk.bf16.mxu0 %vm316_vm0, %v275_v51 }
  0x4e   : > { %1048 = vmatmul.mubr.msk.bf16.gmra.mrb[28].mxu0 %vm316_vm0, %v276_v54 }
  0xe9   : > { %v1021_v61 = vpop.f32.mrb[0].mxu0 }
  0xea   : > { %v408_v62 = vadd.f32 %v1021_v61, %v1406_v60  ;;  %v399_v63 = vpop.f32.mrb[1].mxu0 }
  0xeb   : > { %v400_v0 = vadd.f32 %v1406_v60, %v399_v63  ;;  %v1022_v1 = vpop.f32.mrb[2].mxu0 }
  0xec   : > { %1135 = vtanh.f32 %v408_v62  ;;  %v411_v2 = vadd.f32 %v1022_v1, %v1406_v60  ;;  %v402_v3 = vpop.f32.mrb[3].mxu0 }
  0xed   : > { %1137 = vtanh.f32 %v400_v0  ;;  %v403_v4 = vadd.f32 %v1406_v60, %v402_v3 }
  0xee   : > { %1139 = vtanh.f32 %v411_v2 }
  0xef   : > { %1141 = vtanh.f32 %v403_v4 }
  0xf1   : > { %v1025_v5 = vpop.f32.mrb[4].mxu0 }
  0xf2   : > { %v424_v6 = vadd.f32 %v1025_v5, %v1406_v60  ;;  %v415_v7 = vpop.f32.mrb[5].mxu0 }
  0xf3   : > { %v416_v8 = vadd.f32 %v1406_v60, %v415_v7  ;;  %v1026_v9 = vpop.f32.mrb[6].mxu0 }
  0xf4   : > { %1143 = vtanh.f32 %v424_v6  ;;  %v427_v10 = vadd.f32 %v1026_v9, %v1406_v60  ;;  %v418_v11 = vpop.f32.mrb[7].mxu0 }
  0xf5   : > { %1145 = vtanh.f32 %v416_v8  ;;  %v419_v12 = vadd.f32 %v1406_v60, %v418_v11 }
  0xf6   : > { %v1136_v13 = vpop.eup %1135  ;;  %1147 = vtanh.f32 %v427_v10 }
  0xf7   : > { %v1138_v14 = vpop.eup %1137  ;;  %1149 = vtanh.f32 %v419_v12 }
  0xf8   : > { %v1140_v15 = vpop.eup %1139 }
  0xf9   : > { %v1142_v16 = vpop.eup %1141  ;;  %v1029_v17 = vpop.f32.mrb[8].mxu0  ;;  %v559_v18 = vpack.c.bf16 %v1140_v15, %v1136_v13 }
  0xfa   : > { %v440_v19 = vadd.f32 %v1029_v17, %v1406_v60  ;;  %v431_v20 = vpop.f32.mrb[9].mxu0  ;;  %v558_v21 = vpack.c.bf16 %v1142_v16, %v1138_v14 }
  0xfb   : > { %v432_v22 = vadd.f32 %v1406_v60, %v431_v20  ;;  %v1030_v23 = vpop.f32.mrb[10].mxu0 }
  0xfc   : > { %1151 = vtanh.f32 %v440_v19  ;;  %v443_v24 = vadd.f32 %v1030_v23, %v1406_v60  ;;  %v434_v25 = vpop.f32.mrb[11].mxu0  ;;  %1067 = vmatprep.mubr.bf16.mxu0 %v558_v21 }
  0xfd   : > { %1153 = vtanh.f32 %v432_v22  ;;  %v435_v26 = vadd.f32 %v1406_v60, %v434_v25  ;;  %1068 = vmatmul.mubr.bf16.vlgmr.msra.gmra.mrb[32].mxu0 %v559_v18 }
  0xfe   : > { %v1144_v27 = vpop.eup %1143  ;;  %1155 = vtanh.f32 %v443_v24 }
  0xff   : > { %v1146_v28 = vpop.eup %1145  ;;  %1157 = vtanh.f32 %v435_v26 }
 0x100   : > { %v1148_v29 = vpop.eup %1147 }
 0x101   : > { %v1150_v30 = vpop.eup %1149  ;;  %v1033_v31 = vpop.f32.mrb[12].mxu0  ;;  %v561_v32 = vpack.c.bf16 %v1148_v29, %v1144_v27 }
 0x102   : > { %v456_v33 = vadd.f32 %v1033_v31, %v1406_v60  ;;  %v447_v34 = vpop.f32.mrb[13].mxu0  ;;  %v560_v35 = vpack.c.bf16 %v1150_v30, %v1146_v28 }
 0x103   : > { %v448_v36 = vadd.f32 %v1406_v60, %v447_v34  ;;  %v1034_v37 = vpop.f32.mrb[14].mxu0 }
 0x104   : > { %1159 = vtanh.f32 %v456_v33  ;;  %v459_v38 = vadd.f32 %v1034_v37, %v1406_v60  ;;  %v450_v39 = vpop.f32.mrb[15].mxu0  ;;  %1071 = vmatprep.mubr.bf16.mxu1 %v560_v35 }
 0x105   : > { %1161 = vtanh.f32 %v448_v36  ;;  %v451_v40 = vadd.f32 %v1406_v60, %v450_v39  ;;  %1072 = vmatmul.mubr.bf16.vlgmr.msra.gmra.mrb[0].mxu1 %v561_v32 }
 0x106   : > { %v1152_v41 = vpop.eup %1151  ;;  %1163 = vtanh.f32 %v459_v38 }
 0x107   : > { %v1154_v42 = vpop.eup %1153  ;;  %1165 = vtanh.f32 %v451_v40 }
 0x108   : > { %v1156_v43 = vpop.eup %1155 }
 0x109   : > { %v1158_v44 = vpop.eup %1157  ;;  %v1037_v45 = vpop.f32.mrb[16].mxu0  ;;  %v563_v46 = vpack.c.bf16 %v1156_v43, %v1152_v41 }
 0x10a   : > { %v472_v47 = vadd.f32 %v1037_v45, %v1406_v60  ;;  %v463_v48 = vpop.f32.mrb[17].mxu0  ;;  %v562_v49 = vpack.c.bf16 %v1158_v44, %v1154_v42 }
 0x10b   : > { %v464_v50 = vadd.f32 %v1406_v60, %v463_v48  ;;  %v1038_v51 = vpop.f32.mrb[18].mxu0 }
 0x10c   : > { %1167 = vtanh.f32 %v472_v47  ;;  %v475_v52 = vadd.f32 %v1038_v51, %v1406_v60  ;;  %v466_v53 = vpop.f32.mrb[19].mxu0  ;;  %1075 = vmatprep.mubr.bf16.mxu1 %v562_v49 }
 0x10d   : > { %1169 = vtanh.f32 %v464_v50  ;;  %v467_v54 = vadd.f32 %v1406_v60, %v466_v53  ;;  %1076 = vmatmul.mubr.bf16.gmra.mrb[4].mxu1 %v563_v46 }
 0x10e   : > { %v1160_v55 = vpop.eup %1159  ;;  %1171 = vtanh.f32 %v475_v52 }
 0x10f   : > { %v1162_v56 = vpop.eup %1161  ;;  %1173 = vtanh.f32 %v467_v54 }
 0x110   : > { %v1164_v57 = vpop.eup %1163 }
 0x111   : > { %v1166_v58 = vpop.eup %1165  ;;  %v1041_v59 = vpop.f32.mrb[20].mxu0  ;;  %v565_v61 = vpack.c.bf16 %v1164_v57, %v1160_v55 }
 0x112   : > { %v488_v62 = vadd.f32 %v1041_v59, %v1406_v60  ;;  %v479_v63 = vpop.f32.mrb[21].mxu0  ;;  %v564_v0 = vpack.c.bf16 %v1166_v58, %v1162_v56 }
 0x113   : > { %v480_v1 = vadd.f32 %v1406_v60, %v479_v63  ;;  %v1042_v2 = vpop.f32.mrb[22].mxu0 }
 0x114   : > { %1175 = vtanh.f32 %v488_v62  ;;  %v491_v3 = vadd.f32 %v1042_v2, %v1406_v60  ;;  %v482_v4 = vpop.f32.mrb[23].mxu0  ;;  %1079 = vmatprep.mubr.bf16.mxu1 %v564_v0 }
 0x115   : > { %1177 = vtanh.f32 %v480_v1  ;;  %v483_v5 = vadd.f32 %v1406_v60, %v482_v4  ;;  %1080 = vmatmul.mubr.bf16.gmra.mrb[8].mxu1 %v565_v61 }
 0x116   : > { %v1168_v6 = vpop.eup %1167  ;;  %1179 = vtanh.f32 %v491_v3 }
 0x117   : > { %v1170_v7 = vpop.eup %1169  ;;  %1181 = vtanh.f32 %v483_v5 }
 0x118   : > { %v1172_v8 = vpop.eup %1171 }
 0x119   : > { %v1174_v9 = vpop.eup %1173  ;;  %v1045_v10 = vpop.f32.mrb[24].mxu0  ;;  %v567_v11 = vpack.c.bf16 %v1172_v8, %v1168_v6 }
 0x11a   : > { %v504_v12 = vadd.f32 %v1045_v10, %v1406_v60  ;;  %v495_v13 = vpop.f32.mrb[25].mxu0  ;;  %v566_v14 = vpack.c.bf16 %v1174_v9, %v1170_v7 }
 0x11b   : > { %v496_v15 = vadd.f32 %v1406_v60, %v495_v13  ;;  %v1046_v16 = vpop.f32.mrb[26].mxu0 }
 0x11c   : > { %1183 = vtanh.f32 %v504_v12  ;;  %v507_v17 = vadd.f32 %v1046_v16, %v1406_v60  ;;  %v498_v18 = vpop.f32.mrb[27].mxu0  ;;  %1083 = vmatprep.mubr.bf16.mxu1 %v566_v14 }
 0x11d   : > { %1185 = vtanh.f32 %v496_v15  ;;  %v499_v19 = vadd.f32 %v1406_v60, %v498_v18  ;;  %1084 = vmatmul.mubr.bf16.gmra.mrb[12].mxu1 %v567_v11 }
 0x11e   : > { %v1176_v20 = vpop.eup %1175  ;;  %1187 = vtanh.f32 %v507_v17 }
 0x11f   : > { %v1178_v21 = vpop.eup %1177  ;;  %1189 = vtanh.f32 %v499_v19 }
 0x120   : > { %v1180_v22 = vpop.eup %1179 }
 0x121   : > { %v1182_v23 = vpop.eup %1181  ;;  %v1049_v24 = vpop.f32.mrb[28].mxu0  ;;  %v569_v25 = vpack.c.bf16 %v1180_v22, %v1176_v20 }
 0x122   : > { %v520_v26 = vadd.f32 %v1049_v24, %v1406_v60  ;;  %v511_v27 = vpop.f32.mrb[29].mxu0  ;;  %v568_v28 = vpack.c.bf16 %v1182_v23, %v1178_v21 }
 0x123   : > { %v512_v29 = vadd.f32 %v1406_v60, %v511_v27  ;;  %v1050_v30 = vpop.f32.mrb[30].mxu0 }
 0x124   : > { %1191 = vtanh.f32 %v520_v26  ;;  %v523_v31 = vadd.f32 %v1050_v30, %v1406_v60  ;;  %v514_v32 = vpop.f32.mrb[31].mxu0  ;;  %1087 = vmatprep.mubr.bf16.mxu1 %v568_v28 }
 0x125   : > { %1193 = vtanh.f32 %v512_v29  ;;  %v515_v33 = vadd.f32 %v1406_v60, %v514_v32  ;;  %1088 = vmatmul.mubr.bf16.gmra.mrb[16].mxu1 %v569_v25  ;;  %v1443_v60 = vld [vmem:[%s1555_s4] ss:$0 sm:$0xff] }
 0x126   : > { %v1184_v34 = vpop.eup %1183  ;;  %1195 = vtanh.f32 %v523_v31 }
 0x127   : > { %v1186_v35 = vpop.eup %1185  ;;  %1197 = vtanh.f32 %v515_v33 }
 0x128   : > { %v1188_v36 = vpop.eup %1187 }
 0x129   : > { %v1190_v37 = vpop.eup %1189  ;;  %v571_v38 = vpack.c.bf16 %v1188_v36, %v1184_v34 }
 0x12a   : > { %v570_v39 = vpack.c.bf16 %v1190_v37, %v1186_v35 }
 0x12c   : > { %1091 = vmatprep.mubr.bf16.mxu1 %v570_v39 }
 0x12d   : > { %1092 = vmatmul.mubr.bf16.gmra.mrb[20].mxu1 %v571_v38 }
 0x12e   : > { %v1192_v40 = vpop.eup %1191 }
 0x12f   : > { %v1194_v41 = vpop.eup %1193 }
 0x130   : > { %v1196_v42 = vpop.eup %1195 }
 0x131   : > { %v1198_v43 = vpop.eup %1197  ;;  %v573_v44 = vpack.c.bf16 %v1196_v42, %v1192_v40 }
 0x132   : > { %v572_v45 = vpack.c.bf16 %v1198_v43, %v1194_v41 }
 0x134   : > { %1095 = vmatprep.mubr.bf16.mxu1 %v572_v45 }
 0x135   : > { %1096 = vmatmul.mubr.bf16.gmra.mrb[24].mxu1 %v573_v44 }
 0x1d0   : > { %v1069_v46 = vpop.f32.mrb[32].mxu0 }
 0x1d1   : > { %v688_v47 = vadd.f32 %v1069_v46, %v1443_v60  ;;  %v679_v48 = vpop.f32.mrb[33].mxu0 }
 0x1d2   : > { %v680_v49 = vadd.f32 %v1443_v60, %v679_v48  ;;  %v1070_v50 = vpop.f32.mrb[34].mxu0 }
 0x1d3   : > { %1199 = vtanh.f32 %v688_v47  ;;  %v691_v51 = vadd.f32 %v1070_v50, %v1443_v60  ;;  %v682_v52 = vpop.f32.mrb[35].mxu0 }
 0x1d4   : > { %1201 = vtanh.f32 %v680_v49  ;;  %v683_v53 = vadd.f32 %v1443_v60, %v682_v52 }
 0x1d5   : > { %1203 = vtanh.f32 %v691_v51 }
 0x1d6   : > { %1205 = vtanh.f32 %v683_v53 }
 0x1d8   : > { %v1073_v54 = vpop.f32.mrb[0].mxu1 }
 0x1d9   : > { %v704_v55 = vadd.f32 %v1073_v54, %v1443_v60  ;;  %v695_v56 = vpop.f32.mrb[1].mxu1 }
 0x1da   : > { %v696_v57 = vadd.f32 %v1443_v60, %v695_v56  ;;  %v1074_v58 = vpop.f32.mrb[2].mxu1 }
 0x1db   : > { %1207 = vtanh.f32 %v704_v55  ;;  %v707_v59 = vadd.f32 %v1074_v58, %v1443_v60  ;;  %v698_v61 = vpop.f32.mrb[3].mxu1 }
 0x1dc   : > { %1209 = vtanh.f32 %v696_v57  ;;  %v699_v62 = vadd.f32 %v1443_v60, %v698_v61 }
 0x1dd   : > { %v1200_v63 = vpop.eup %1199  ;;  %1211 = vtanh.f32 %v707_v59 }
 0x1de   : > { %v1202_v0 = vpop.eup %1201  ;;  %840 = vst.msk [vmem:[%s1456_s8 + $0x10] sm:$0xff] %vm316_vm0, %v1200_v63  ;;  %1213 = vtanh.f32 %v699_v62 }
 0x1df   : > { %v1204_v1 = vpop.eup %1203  ;;  %838 = vst.msk [vmem:[%s1456_s8] sm:$0xff] %vm316_vm0, %v1202_v0 }
 0x1e0   : > { %v1206_v2 = vpop.eup %1205  ;;  %841 = vst.msk [vmem:[%s1456_s8 + $0x18] sm:$0xff] %vm316_vm0, %v1204_v1  ;;  %v1077_v3 = vpop.f32.mrb[4].mxu1 }
 0x1e1   : > { %839 = vst.msk [vmem:[%s1456_s8 + $0x8] sm:$0xff] %vm316_vm0, %v1206_v2  ;;  %v720_v4 = vadd.f32 %v1077_v3, %v1443_v60  ;;  %v711_v5 = vpop.f32.mrb[5].mxu1 }
 0x1e2   : > { %v712_v6 = vadd.f32 %v1443_v60, %v711_v5  ;;  %v1078_v7 = vpop.f32.mrb[6].mxu1 }
 0x1e3   : > { %1215 = vtanh.f32 %v720_v4  ;;  %v723_v8 = vadd.f32 %v1078_v7, %v1443_v60  ;;  %v714_v9 = vpop.f32.mrb[7].mxu1 }
 0x1e4   : > { %1217 = vtanh.f32 %v712_v6  ;;  %v715_v10 = vadd.f32 %v1443_v60, %v714_v9 }
 0x1e5   : > { %v1208_v11 = vpop.eup %1207  ;;  %1219 = vtanh.f32 %v723_v8 }
 0x1e6   : > { %v1210_v12 = vpop.eup %1209  ;;  %844 = vst.msk [vmem:[%s1456_s8 + $0x30] sm:$0xff] %vm316_vm0, %v1208_v11  ;;  %1221 = vtanh.f32 %v715_v10 }
 0x1e7   : > { %v1212_v13 = vpop.eup %1211  ;;  %842 = vst.msk [vmem:[%s1456_s8 + $0x20] sm:$0xff] %vm316_vm0, %v1210_v12 }
 0x1e8   : > { %v1214_v14 = vpop.eup %1213  ;;  %845 = vst.msk [vmem:[%s1456_s8 + $0x38] sm:$0xff] %vm316_vm0, %v1212_v13  ;;  %v1081_v15 = vpop.f32.mrb[8].mxu1 }
 0x1e9   : > { %843 = vst.msk [vmem:[%s1456_s8 + $0x28] sm:$0xff] %vm316_vm0, %v1214_v14  ;;  %v736_v16 = vadd.f32 %v1081_v15, %v1443_v60  ;;  %v727_v17 = vpop.f32.mrb[9].mxu1 }
 0x1ea   : > { %v728_v18 = vadd.f32 %v1443_v60, %v727_v17  ;;  %v1082_v19 = vpop.f32.mrb[10].mxu1 }
 0x1eb   : > { %1223 = vtanh.f32 %v736_v16  ;;  %v739_v20 = vadd.f32 %v1082_v19, %v1443_v60  ;;  %v730_v21 = vpop.f32.mrb[11].mxu1 }
 0x1ec   : > { %1225 = vtanh.f32 %v728_v18  ;;  %v731_v22 = vadd.f32 %v1443_v60, %v730_v21 }
 0x1ed   : > { %v1216_v23 = vpop.eup %1215  ;;  %1227 = vtanh.f32 %v739_v20 }
 0x1ee   : > { %v1218_v24 = vpop.eup %1217  ;;  %848 = vst.msk [vmem:[%s1456_s8 + $0x50] sm:$0xff] %vm316_vm0, %v1216_v23  ;;  %1229 = vtanh.f32 %v731_v22 }
 0x1ef   : > { %v1220_v25 = vpop.eup %1219  ;;  %846 = vst.msk [vmem:[%s1456_s8 + $0x40] sm:$0xff] %vm316_vm0, %v1218_v24 }
 0x1f0   : > { %v1222_v26 = vpop.eup %1221  ;;  %849 = vst.msk [vmem:[%s1456_s8 + $0x58] sm:$0xff] %vm316_vm0, %v1220_v25  ;;  %v1085_v27 = vpop.f32.mrb[12].mxu1 }
 0x1f1   : > { %847 = vst.msk [vmem:[%s1456_s8 + $0x48] sm:$0xff] %vm316_vm0, %v1222_v26  ;;  %v752_v28 = vadd.f32 %v1085_v27, %v1443_v60  ;;  %v743_v29 = vpop.f32.mrb[13].mxu1 }
 0x1f2   : > { %v744_v30 = vadd.f32 %v1443_v60, %v743_v29  ;;  %v1086_v31 = vpop.f32.mrb[14].mxu1 }
 0x1f3   : > { %1231 = vtanh.f32 %v752_v28  ;;  %v755_v32 = vadd.f32 %v1086_v31, %v1443_v60  ;;  %v746_v33 = vpop.f32.mrb[15].mxu1 }
 0x1f4   : > { %1233 = vtanh.f32 %v744_v30  ;;  %v747_v34 = vadd.f32 %v1443_v60, %v746_v33 }
 0x1f5   : > { %v1224_v35 = vpop.eup %1223  ;;  %1235 = vtanh.f32 %v755_v32 }
 0x1f6   : > { %v1226_v36 = vpop.eup %1225  ;;  %852 = vst.msk [vmem:[%s1456_s8 + $0x70] sm:$0xff] %vm316_vm0, %v1224_v35  ;;  %1237 = vtanh.f32 %v747_v34 }
 0x1f7   : > { %v1228_v37 = vpop.eup %1227  ;;  %850 = vst.msk [vmem:[%s1456_s8 + $0x60] sm:$0xff] %vm316_vm0, %v1226_v36 }
 0x1f8   : > { %v1230_v38 = vpop.eup %1229  ;;  %853 = vst.msk [vmem:[%s1456_s8 + $0x78] sm:$0xff] %vm316_vm0, %v1228_v37  ;;  %v1089_v39 = vpop.f32.mrb[16].mxu1 }
 0x1f9   : > { %851 = vst.msk [vmem:[%s1456_s8 + $0x68] sm:$0xff] %vm316_vm0, %v1230_v38  ;;  %v768_v40 = vadd.f32 %v1089_v39, %v1443_v60  ;;  %v759_v41 = vpop.f32.mrb[17].mxu1 }
 0x1fa   : > { %v760_v42 = vadd.f32 %v1443_v60, %v759_v41  ;;  %v1090_v43 = vpop.f32.mrb[18].mxu1 }
 0x1fb   : > { %1239 = vtanh.f32 %v768_v40  ;;  %v771_v44 = vadd.f32 %v1090_v43, %v1443_v60  ;;  %v762_v45 = vpop.f32.mrb[19].mxu1 }
 0x1fc   : > { %1241 = vtanh.f32 %v760_v42  ;;  %v763_v46 = vadd.f32 %v1443_v60, %v762_v45 }
 0x1fd   : > { %v1232_v47 = vpop.eup %1231  ;;  %1243 = vtanh.f32 %v771_v44 }
 0x1fe   : > { %v1234_v48 = vpop.eup %1233  ;;  %856 = vst.msk [vmem:[%s1456_s8 + $0x90] sm:$0xff] %vm316_vm0, %v1232_v47  ;;  %1245 = vtanh.f32 %v763_v46 }
 0x1ff   : > { %v1236_v49 = vpop.eup %1235  ;;  %854 = vst.msk [vmem:[%s1456_s8 + $0x80] sm:$0xff] %vm316_vm0, %v1234_v48 }
 0x200   : > { %v1238_v50 = vpop.eup %1237  ;;  %857 = vst.msk [vmem:[%s1456_s8 + $0x98] sm:$0xff] %vm316_vm0, %v1236_v49  ;;  %v1093_v51 = vpop.f32.mrb[20].mxu1 }
 0x201   : > { %855 = vst.msk [vmem:[%s1456_s8 + $0x88] sm:$0xff] %vm316_vm0, %v1238_v50  ;;  %v784_v52 = vadd.f32 %v1093_v51, %v1443_v60  ;;  %v775_v53 = vpop.f32.mrb[21].mxu1 }
 0x202   : > { %v776_v54 = vadd.f32 %v1443_v60, %v775_v53  ;;  %v1094_v55 = vpop.f32.mrb[22].mxu1 }
 0x203   : > { %1247 = vtanh.f32 %v784_v52  ;;  %v787_v56 = vadd.f32 %v1094_v55, %v1443_v60  ;;  %v778_v57 = vpop.f32.mrb[23].mxu1 }
 0x204   : > { %1249 = vtanh.f32 %v776_v54  ;;  %v779_v58 = vadd.f32 %v1443_v60, %v778_v57 }
 0x205   : > { %v1240_v59 = vpop.eup %1239  ;;  %1251 = vtanh.f32 %v787_v56 }
 0x206   : > { %v1242_v61 = vpop.eup %1241  ;;  %860 = vst.msk [vmem:[%s1456_s8 + $0xb0] sm:$0xff] %vm316_vm0, %v1240_v59  ;;  %1253 = vtanh.f32 %v779_v58 }
 0x207   : > { %v1244_v62 = vpop.eup %1243  ;;  %858 = vst.msk [vmem:[%s1456_s8 + $0xa0] sm:$0xff] %vm316_vm0, %v1242_v61 }
 0x208   : > { %v1246_v63 = vpop.eup %1245  ;;  %861 = vst.msk [vmem:[%s1456_s8 + $0xb8] sm:$0xff] %vm316_vm0, %v1244_v62  ;;  %v1097_v0 = vpop.f32.mrb[24].mxu1 }
 0x209   : > { %859 = vst.msk [vmem:[%s1456_s8 + $0xa8] sm:$0xff] %vm316_vm0, %v1246_v63  ;;  %v800_v1 = vadd.f32 %v1097_v0, %v1443_v60  ;;  %v791_v2 = vpop.f32.mrb[25].mxu1 }
 0x20a   : > { %v792_v3 = vadd.f32 %v1443_v60, %v791_v2  ;;  %v1098_v4 = vpop.f32.mrb[26].mxu1 }
 0x20b   : > { %1255 = vtanh.f32 %v800_v1  ;;  %v803_v5 = vadd.f32 %v1098_v4, %v1443_v60  ;;  %v794_v6 = vpop.f32.mrb[27].mxu1 }
 0x20c   : > { %1257 = vtanh.f32 %v792_v3  ;;  %v795_v7 = vadd.f32 %v1443_v60, %v794_v6 }
 0x20d   : > { %v1248_v8 = vpop.eup %1247  ;;  %1259 = vtanh.f32 %v803_v5 }
 0x20e   : > { %v1250_v9 = vpop.eup %1249  ;;  %864 = vst.msk [vmem:[%s1456_s8 + $0xd0] sm:$0xff] %vm316_vm0, %v1248_v8  ;;  %1261 = vtanh.f32 %v795_v7 }
 0x20f   : > { %v1252_v10 = vpop.eup %1251  ;;  %862 = vst.msk [vmem:[%s1456_s8 + $0xc0] sm:$0xff] %vm316_vm0, %v1250_v9 }
 0x210   : > { %v1254_v11 = vpop.eup %1253  ;;  %865 = vst.msk [vmem:[%s1456_s8 + $0xd8] sm:$0xff] %vm316_vm0, %v1252_v10 }
 0x211   : > { %863 = vst.msk [vmem:[%s1456_s8 + $0xc8] sm:$0xff] %vm316_vm0, %v1254_v11 }
 0x215   : > { %v1256_v12 = vpop.eup %1255 }
 0x216   : > { %v1258_v13 = vpop.eup %1257  ;;  %868 = vst.msk [vmem:[%s1456_s8 + $0xf0] sm:$0xff] %vm316_vm0, %v1256_v12 }
 0x217   : > { %v1260_v60 = vpop.eup %1259  ;;  %866 = vst.msk [vmem:[%s1456_s8 + $0xe0] sm:$0xff] %vm316_vm0, %v1258_v13 }
 0x218   : > { %v1262_v14 = vpop.eup %1261  ;;  %869 = vst.msk [vmem:[%s1456_s8 + $0xf8] sm:$0xff] %vm316_vm0, %v1260_v60 }
 0x219   : > { %867 = vst.msk [vmem:[%s1456_s8 + $0xe8] sm:$0xff] %vm316_vm0, %v1262_v14 }
 0x21a PF: > { %s15_s18 = sadd.s32 1, %s1269_s18  }
 0x21b   : > { %p12_p4 = scmp.ge.s32.totalorder %s15_s18, 4  }
 0x21d   :  { %14 = sbr.rel (!%p12_p4) target bundleno = 1 (0x1), region = 70 }

</bundles_post_ra>
